<compile_context>
chip_gen: v7x
topology: tpu7x:2x2x1
jax: 0.10.0
libtpu: 0.0.40
codegen_flags: <defaults>
</compile_context>

<pallas_src>
import functools

import jax
import jax.numpy as jnp
from jax import lax
from jax.experimental import pallas as pl
from jax.experimental.pallas import tpu as pltpu


def _round_up(x, m):
    return (x + m - 1) // m * m


# ---------------------------------------------------------------------------
# Pass 1: tiled conv-as-matmul (bf16 operands, f32 accumulation) that also
# emits per-M-tile BatchNorm partial statistics (sum, sum of squares).
# ---------------------------------------------------------------------------
def _conv_stats_kernel(p_ref, w_ref, conv_ref, stats_ref, acc_ref):
    k = pl.program_id(1)

    @pl.when(k == 0)
    def _():
        acc_ref[...] = jnp.zeros_like(acc_ref)

    acc_ref[...] += jnp.dot(p_ref[...], w_ref[...],
                            preferred_element_type=jnp.float32)

    @pl.when(k == pl.num_programs(1) - 1)
    def _():
        acc = acc_ref[...]                                   # (TM, Cp) f32
        conv_ref[...] = acc
        s = jnp.sum(acc, axis=0, keepdims=True)              # (1, Cp)
        q = jnp.sum(acc * acc, axis=0, keepdims=True)        # (1, Cp)
        pad = jnp.zeros((6, acc.shape[1]), jnp.float32)
        stats_ref[...] = jnp.concatenate([s, q, pad], axis=0)[None, :, :]


# ---------------------------------------------------------------------------
# Pass 2: fused BatchNorm affine (y = x*scale + shift) + ReLU / LeakyReLU.
# ---------------------------------------------------------------------------
def _bn_act_kernel(conv_ref, scale_ref, shift_ref, out_ref, *, negative_slope):
    y = conv_ref[...] * scale_ref[...] + shift_ref[...]
    out_ref[...] = jnp.where(y > 0, y, negative_slope * y)


def pix2pix_block_down(x, weight, gamma, beta, *, relu=False, drop=False,
                       eps=1e-5):
    """Block(in_ch, out_ch, down=True, relu=relu, drop=drop).forward(x).

    x:      (N, C_in, H, W) float32 (NCHW, like PyTorch)
    weight: (C_out, C_in, 4, 4)  Conv2d weight, bias=False
    gamma, beta: (C_out,)        BatchNorm2d affine parameters
    """
    # TODO(synk): down=False branch (ConvTranspose2d(4, stride=2, pad=1)) not implemented.
    # TODO(synk): nn.Dropout(0.5) training-mode stochastic masking not applied;
    #             `drop=True` maps to eval-mode identity here.
    del drop

    N, C_in, H, W = x.shape
    C_out = weight.shape[0]
    H_out, W_out = H // 2, W // 2
    M = N * H_out * W_out
    K = 16 * C_in

    # ---- im2col with taps stacked on the LAST axis (no 16x-expanded transpose) ----
    x_nhwc = jnp.transpose(x, (0, 2, 3, 1))                      # cheap, input-sized
    xpad = jnp.pad(x_nhwc, ((0, 0), (1, 1), (1, 1), (0, 0)), mode="reflect")
    cols = []
    for ky in range(4):
        for kx in range(4):
            cols.append(xpad[:, ky:ky + 2 * H_out:2, kx:kx + 2 * W_out:2, :])
    patches = jnp.concatenate(cols, axis=-1).reshape(M, K)       # (M, 16*C_in)
    # weight (C_out, C_in, 4, 4) -> (ky, kx, c_in, C_out) -> (K, C_out), matching patches.
    w_mat = jnp.transpose(weight, (2, 3, 1, 0)).reshape(K, C_out)

    # ---- tiling / padding (lane dims multiples of 128, MXU-friendly K tiles) ----
    TK = 512 if K >= 512 else _round_up(K, 128)
    K_pad = _round_up(K, TK)
    TM = 512 if M >= 512 else _round_up(M, 8)
    M_pad = _round_up(M, TM)
    C_pad = _round_up(C_out, 128)
    n_m, n_k = M_pad // TM, K_pad // TK

    patches_p = jnp.pad(patches, ((0, M_pad - M), (0, K_pad - K))
                        ).astype(jnp.bfloat16)
    w_p = jnp.pad(w_mat, ((0, K_pad - K), (0, C_pad - C_out))
                  ).astype(jnp.bfloat16)

    cost = pl.CostEstimate(
        flops=2 * M_pad * K_pad * C_pad,
        transcendentals=0,
        bytes_accessed=(M_pad * K_pad * 2 + K_pad * C_pad * 2
                        + M_pad * C_pad * 4),
    )

    conv_out, stats = pl.pallas_call(
        _conv_stats_kernel,
        out_shape=(jax.ShapeDtypeStruct((M_pad, C_pad), jnp.float32),
                   jax.ShapeDtypeStruct((n_m, 8, C_pad), jnp.float32)),
        grid_spec=pltpu.PrefetchScalarGridSpec(
            num_scalar_prefetch=0,
            grid=(n_m, n_k),
            in_specs=[
                pl.BlockSpec((TM, TK), lambda i, k: (i, k)),
                pl.BlockSpec((TK, C_pad), lambda i, k: (k, 0)),
            ],
            out_specs=[
                pl.BlockSpec((TM, C_pad), lambda i, k: (i, 0)),
                pl.BlockSpec((1, 8, C_pad), lambda i, k: (i, 0, 0)),
            ],
            scratch_shapes=[pltpu.VMEM((TM, C_pad), jnp.float32)]),
        compiler_params=pltpu.CompilerParams(
            dimension_semantics=("parallel", "arbitrary"),
            vmem_limit_bytes=32 * 1024 * 1024),
        cost_estimate=cost,
    )(patches_p, w_p)

    # ---- tiny per-channel reduction + BN fold (C_out-sized, plain JAX) ----
    m_count = jnp.float32(M)          # padded rows are exact zeros -> no bias
    ch_sum = jnp.sum(stats[:, 0, :], axis=0)
    ch_ssq = jnp.sum(stats[:, 1, :], axis=0)
    mean = ch_sum / m_count
    var = jnp.maximum(ch_ssq / m_count - mean * mean, 0.0)
    gamma_p = jnp.pad(gamma.astype(jnp.float32), (0, C_pad - C_out))
    beta_p = jnp.pad(beta.astype(jnp.float32), (0, C_pad - C_out))
    scale = gamma_p * lax.rsqrt(var + eps)
    shift = beta_p - mean * scale

    out_p = pl.pallas_call(
        functools.partial(_bn_act_kernel,
                          negative_slope=0.0 if relu else 0.2),
        out_shape=jax.ShapeDtypeStruct((M_pad, C_pad), jnp.float32),
        grid_spec=pltpu.PrefetchScalarGridSpec(
            num_scalar_prefetch=0,
            grid=(n_m,),
            in_specs=[
                pl.BlockSpec((TM, C_pad), lambda i: (i, 0)),
                pl.BlockSpec((1, C_pad), lambda i: (0, 0)),
                pl.BlockSpec((1, C_pad), lambda i: (0, 0)),
            ],
            out_specs=pl.BlockSpec((TM, C_pad), lambda i: (i, 0))),
        compiler_params=pltpu.CompilerParams(
            dimension_semantics=("parallel",),
            vmem_limit_bytes=32 * 1024 * 1024),
    )(conv_out, scale.reshape(1, C_pad), shift.reshape(1, C_pad))

    y = out_p[:M, :C_out].reshape(N, H_out, W_out, C_out)
    return jnp.transpose(y, (0, 3, 1, 2))                        # back to NCHW


def _reference(x, weight, gamma, beta, *, relu, eps=1e-5):
    """Pure-JAX reference of the same forward pass (bf16 conv operands to match
    the kernel's MXU dtype; everything else in f32)."""
    xpad = jnp.pad(x, ((0, 0), (0, 0), (1, 1), (1, 1)), mode="reflect")
    y = lax.conv_general_dilated(
        xpad.astype(jnp.bfloat16), weight.astype(jnp.bfloat16),
        window_strides=(2, 2), padding="VALID",
        dimension_numbers=("NCHW", "OIHW", "NCHW"),
        preferred_element_type=jnp.float32)
    mean = y.mean(axis=(0, 2, 3), keepdims=True)
    var = ((y - mean) ** 2).mean(axis=(0, 2, 3), keepdims=True)
    yhat = (y - mean) * lax.rsqrt(var + eps)
    y = yhat * gamma.reshape(1, -1, 1, 1) + beta.reshape(1, -1, 1, 1)
    slope = 0.0 if relu else 0.2
    return jnp.where(y > 0, y, slope * y)


if __name__ == "__main__":
    key = jax.random.PRNGKey(0)
    k_x, k_w = jax.random.split(key)

    N, C_in, C_out, H, W = 2, 4, 8, 16, 16
    x = jax.random.normal(k_x, (N, C_in, H, W), dtype=jnp.float32)
    weight = 0.1 * jax.random.normal(k_w, (C_out, C_in, 4, 4), dtype=jnp.float32)
    gamma = jnp.ones((C_out,), dtype=jnp.float32)
    beta = jnp.zeros((C_out,), dtype=jnp.float32)

    out = pix2pix_block_down(x, weight, gamma, beta, relu=False, drop=False)
    out = jax.block_until_ready(out)

    ref = _reference(x, weight, gamma, beta, relu=False)
    assert out.shape == (N, C_out, H // 2, W // 2), out.shape
    assert jnp.allclose(out, ref, atol=2e-2, rtol=2e-2), float(
        jnp.max(jnp.abs(out - ref)))

    print("KERNEL_OK")
</pallas_src>

<mosaic_0001>
module attributes {stable_mosaic.version = 11 : i64} {
  func.func @_conv_stats_kernel(%arg0: i32, %arg1: i32, %arg2: memref<128x128xbf16, #tpu.memory_space<vmem>>, %arg3: memref<128x128xbf16, #tpu.memory_space<vmem>>, %arg4: memref<128x128xf32, #tpu.memory_space<vmem>>, %arg5: memref<1x8x128xf32, #tpu.memory_space<vmem>>, %arg6: memref<128x128xf32, #tpu.memory_space<vmem>>) attributes {dimension_semantics = [#tpu.dimension_semantics<parallel>, #tpu.dimension_semantics<arbitrary>], iteration_bounds = array<i64: 1, 1>, scalar_prefetch = 0 : i64, scratch_operands = 1 : i64, tpu.core_type = #tpu.core_type<tc>, window_params = [{transform_indices = @transform_0, window_bounds = array<i64: 128, 128>}, {transform_indices = @transform_1, window_bounds = array<i64: 128, 128>}, {transform_indices = @transform_2, window_bounds = array<i64: 128, 128>}, {transform_indices = @transform_3, window_bounds = array<i64: 1, 8, 128>}]} {
    %c0_i32 = arith.constant 0 : i32
    %0 = arith.cmpi eq, %arg1, %c0_i32 : i32
    %1 = arith.extui %0 : i1 to i32
    %c0_i32_0 = arith.constant 0 : i32
    %2 = arith.cmpi ne, %1, %c0_i32_0 : i32
    scf.if %2 {
      %cst_10 = arith.constant 0.000000e+00 : f32
      %12 = vector.broadcast %cst_10 : f32 to vector<128x128xf32>
      %c0_11 = arith.constant 0 : index
      %c0_12 = arith.constant 0 : index
      %13 = vector.load %arg6[%c0_11, %c0_12] : memref<128x128xf32, #tpu.memory_space<vmem>>, vector<128x128xf32>
      tpu.vector_store %arg6[%c0_11, %c0_12], %12 {strides = array<i32>} : memref<128x128xf32, #tpu.memory_space<vmem>>, vector<128x128xf32>,
    } else {
    }
    %c0 = arith.constant 0 : index
    %c0_1 = arith.constant 0 : index
    %3 = vector.load %arg6[%c0, %c0_1] : memref<128x128xf32, #tpu.memory_space<vmem>>, vector<128x128xf32>
    %c0_2 = arith.constant 0 : index
    %c0_3 = arith.constant 0 : index
    %4 = vector.load %arg2[%c0_2, %c0_3] : memref<128x128xbf16, #tpu.memory_space<vmem>>, vector<128x128xbf16>
    %c0_4 = arith.constant 0 : index
    %c0_5 = arith.constant 0 : index
    %5 = vector.load %arg3[%c0_4, %c0_5] : memref<128x128xbf16, #tpu.memory_space<vmem>>, vector<128x128xbf16>
    %cst = arith.constant dense<0.000000e+00> : vector<128x128xf32>
    %6 = tpu.matmul %4, %5, %cst {dimension_numbers = #tpu.dot_dimension_numbers<[1], [0], [0], [1], [0, 0, 1, 1], [], []>} : vector<128x128xbf16>, vector<128x128xbf16>, vector<128x128xf32> -> vector<128x128xf32>
    %7 = arith.addf %3, %6 : vector<128x128xf32>
    %c0_6 = arith.constant 0 : index
    %c0_7 = arith.constant 0 : index
    %8 = vector.load %arg6[%c0_6, %c0_7] : memref<128x128xf32, #tpu.memory_space<vmem>>, vector<128x128xf32>
    tpu.vector_store %arg6[%c0_6, %c0_7], %7 {strides = array<i32>} : memref<128x128xf32, #tpu.memory_space<vmem>>, vector<128x128xf32>,
    %c0_i32_8 = arith.constant 0 : i32
    %9 = arith.cmpi eq, %arg1, %c0_i32_8 : i32
    %10 = arith.extui %9 : i1 to i32
    %c0_i32_9 = arith.constant 0 : i32
    %11 = arith.cmpi ne, %10, %c0_i32_9 : i32
    scf.if %11 {
      %c0_10 = arith.constant 0 : index
      %c0_11 = arith.constant 0 : index
      %12 = vector.load %arg6[%c0_10, %c0_11] : memref<128x128xf32, #tpu.memory_space<vmem>>, vector<128x128xf32>
      %c0_12 = arith.constant 0 : index
      %c0_13 = arith.constant 0 : index
      %13 = vector.load %arg4[%c0_12, %c0_13] : memref<128x128xf32, #tpu.memory_space<vmem>>, vector<128x128xf32>
      tpu.vector_store %arg4[%c0_12, %c0_13], %12 {strides = array<i32>} : memref<128x128xf32, #tpu.memory_space<vmem>>, vector<128x128xf32>,
      %cst_14 = arith.constant dense<0.000000e+00> : vector<128xf32>
      %14 = vector.multi_reduction <add>, %12, %cst_14 [0] : vector<128x128xf32> to vector<128xf32>
      %15 = vector.shape_cast %14 : vector<128xf32> to vector<1x128xf32>
      %16 = arith.mulf %12, %12 : vector<128x128xf32>
      %cst_15 = arith.constant dense<0.000000e+00> : vector<128xf32>
      %17 = vector.multi_reduction <add>, %16, %cst_15 [0] : vector<128x128xf32> to vector<128xf32>
      %18 = vector.shape_cast %17 : vector<128xf32> to vector<1x128xf32>
      %cst_16 = arith.constant 0.000000e+00 : f32
      %19 = vector.broadcast %cst_16 : f32 to vector<6x128xf32>
      %20 = tpu.concatenate %15, %18, %19 in 0 : vector<1x128xf32>, vector<1x128xf32>, vector<6x128xf32> -> vector<8x128xf32>
      %21 = vector.shape_cast %20 : vector<8x128xf32> to vector<1x8x128xf32>
      %c0_17 = arith.constant 0 : index
      %c0_18 = arith.constant 0 : index
      %c0_19 = arith.constant 0 : index
      %22 = vector.load %arg5[%c0_17, %c0_18, %c0_19] : memref<1x8x128xf32, #tpu.memory_space<vmem>>, vector<1x8x128xf32>
      tpu.vector_store %arg5[%c0_17, %c0_18, %c0_19], %21 {strides = array<i32>} : memref<1x8x128xf32, #tpu.memory_space<vmem>>, vector<1x8x128xf32>,
    } else {
    }
    return
  }
  func.func @transform_0(%arg0: i32, %arg1: i32) -> (i32, i32) {
    %c0_i32 = arith.constant 0 : i32
    return %arg0, %arg1 : i32, i32
  }
  func.func @transform_1(%arg0: i32, %arg1: i32) -> (i32, i32) {
    %c0_i32 = arith.constant 0 : i32
    %c0_i32_0 = arith.constant 0 : i32
    return %arg1, %c0_i32 : i32, i32
  }
  func.func @transform_2(%arg0: i32, %arg1: i32) -> (i32, i32) {
    %c0_i32 = arith.constant 0 : i32
    %c0_i32_0 = arith.constant 0 : i32
    return %arg0, %c0_i32 : i32, i32
  }
  func.func @transform_3(%arg0: i32, %arg1: i32) -> (i32, i32, i32) {
    %c0_i32 = arith.constant 0 : i32
    %c0_i32_0 = arith.constant 0 : i32
    %c0_i32_1 = arith.constant 0 : i32
    return %arg0, %c0_i32, %c0_i32_0 : i32, i32, i32
  }
}

</mosaic_0001>

<bundles_post_ra>
// kernel: tpu_custom_call.1
= control target key start
LH: loop header
LB: loop body
LE: loop exit
PB: predicated region body
PF: predicated region fallthrough
CT: control target
= control target key end

     0   :  { %9 = vsyncpa [#allocation4], 0  ;;  %s761_s0 = inlined_call_operand.hbm [shape: bf16[128,128], index: 0, kind: input, shape index: {}]   ;;  %s762_s1 = inlined_call_operand.hbm [shape: bf16[128,128], index: 1, kind: input, shape index: {}]   ;;  %s763_s2 = inlined_call_operand.hbm [shape: f32[128,128], index: 2, kind: output, shape index: {0}]   ;;  %s764_s3 = inlined_call_operand.hbm [shape: f32[1,8,128], index: 3, kind: output, shape index: {1}]  }
   0x1   :  { %10 = vsyncpa [#allocation7], 0 }
   0x2   :  { %11 = vsyncpa [#allocation5], 0 }
   0x3   :  { %12 = vsyncpa [#allocation10], 0  ;;  %s667_s12 = smov [#allocation3]   ;;  %s571_s16 = scalar_lea.hbm %s761_s0, 1024 }
   0x4   :  { %s18_s13 = sshll.u32 %s667_s12, 4  ;;  %p572_p0 = scmp.ne.s32.totalorder %s761_s0, %s571_s16  ;;  %s19_s13 = int_to_ptr.vmem [resolvable:$true] %s18_s13 }
   0x5   :  { %p575_p1 = scmp.lt.u32.totalorder %s571_s16, %s761_s0 }
   0x7   :  { %p577_p2 = pnand %p575_p1, %p572_p0 }
   0x9   :  { %580 = shalt.err (!%p577_p2)
}
   0xa   :  { %s581_s21 = scalar_lea.vmem %s19_s13, 1024  ;;  %p586_p4 = scmp.lt.s32.totalorder %s19_s13, %s19_s13 }
   0xb   :  { %p582_p3 = scmp.ne.s32.totalorder %s19_s13, %s581_s21  ;;  %p587_p5 = scmp.lt.s32.totalorder %s581_s21, %s581_s21 }
   0xd   :  { %p588_p6 = por %p587_p5, %p586_p4 }
   0xf   :  { %p589_p7 = pnand %p588_p6, %p582_p3 }
  0x11   :  { %592 = shalt.err (!%p589_p7)
}
  0x12   :  { %s668_s22 = smov 64   ;;  %s669_s23 = smov 4  }
  0x13   :  { %24 = dma.hbm_to_vmem [thread:$0]  %s761_s0, 1024, %s19_s13, [#allocation4], %s668_s22, %s668_s22, %s669_s23  }
  0x14   :  { %s670_s26 = smov [#allocation6]   ;;  %s593_s30 = scalar_lea.hbm %s762_s1, 1024 }
  0x15   :  { %s30_s27 = sshll.u32 %s670_s26, 4  ;;  %p594_p8 = scmp.ne.s32.totalorder %s762_s1, %s593_s30  ;;  %s31_s27 = int_to_ptr.vmem [resolvable:$true] %s30_s27 }
  0x16   :  { %p597_p9 = scmp.lt.u32.totalorder %s593_s30, %s762_s1 }
  0x18   :  { %p599_p10 = pnand %p597_p9, %p594_p8 }
  0x1a   :  { %602 = shalt.err (!%p599_p10)
}
  0x1b   :  { %s603_s8 = scalar_lea.vmem %s31_s27, 1024  ;;  %p608_p12 = scmp.lt.s32.totalorder %s31_s27, %s31_s27 }
  0x1c   :  { %p604_p11 = scmp.ne.s32.totalorder %s31_s27, %s603_s8  ;;  %p609_p13 = scmp.lt.s32.totalorder %s603_s8, %s603_s8 }
  0x1e   :  { %p610_p0 = por %p609_p13, %p608_p12 }
  0x20   :  { %p611_p1 = pnand %p610_p0, %p604_p11 }
  0x22   :  { %614 = shalt.err (!%p611_p1)
}
  0x23   :  { %36 = dma.hbm_to_vmem [thread:$0]  %s762_s1, 1024, %s31_s27, [#allocation7], %s668_s22, %s668_s22, %s669_s23  }
  0x24   :  { %659 = dma.done.wait [#allocation4], 1024  }
  0x25   :  { %660 = vsyncadd [#allocation4], 4294966272 }
  0x26   :  { %661 = dma.done.wait [#allocation7], 1024  }
  0x27   :  { %662 = vsyncadd [#allocation7], 4294966272  ;;  %v555_v0 = vld [vmem:[#allocation6] sm:$0xff]   ;;  %v556_v1 = vld [vmem:[#allocation6 + $0x8] sm:$0xff]   ;;  %s671_s1 = smov [#allocation8]  }
  0x28   :  { %499 = vmatprep.subr.bf16.mxu0 %v555_v0  ;;  %531 = vmatprep.subr.bf16.mxu1 %v555_v0  ;;  %v557_v2 = vld [vmem:[#allocation6 + $0x10] sm:$0xff]   ;;  %v558_v3 = vld [vmem:[#allocation6 + $0x18] sm:$0xff]   ;;  %v563_v4 = vld [vmem:[#allocation3] sm:$0xff]   ;;  %s440_s10 = sshll.u32 %s671_s1, 4  ;;  %s441_s10 = int_to_ptr.vmem [resolvable:$true] %s440_s10 }
  0x29   :  { %500 = vmatpush3.bf16.msra.mxu0 %v555_v0  ;;  %539 = vmatpush3.bf16.msra.mxu1 %v555_v0  ;;  %v559_v5 = vld [vmem:[#allocation6 + $0x20] sm:$0xff]   ;;  %v560_v7 = vld [vmem:[#allocation6 + $0x28] sm:$0xff]   ;;  %v561_v8 = vld [vmem:[#allocation6 + $0x30] sm:$0xff]   ;;  %s615_s11 = scalar_lea.vmem %s441_s10, 2048  ;;  %p620_p3 = scmp.lt.s32.totalorder %s441_s10, %s441_s10 }
  0x2a   :  { %501 = vmatprep.subr.bf16.mxu0 %v556_v1  ;;  %532 = vmatprep.subr.bf16.mxu1 %v556_v1  ;;  %v567_v6 = vld [vmem:[#allocation3 + $0x20] sm:$0xff]   ;;  %v562_v9 = vld [vmem:[#allocation6 + $0x38] sm:$0xff]   ;;  %v564_v10 = vld [vmem:[#allocation3 + $0x8] sm:$0xff]   ;;  %p616_p2 = scmp.ne.s32.totalorder %s441_s10, %s615_s11  ;;  %p621_p4 = scmp.lt.s32.totalorder %s615_s11, %s615_s11 }
  0x2b   :  { %515 = vmatprep.mubr.bf16.mxu0 %v563_v4  ;;  %523 = vmatprep.mubr.bf16.mxu1 %v567_v6  ;;  %v568_v11 = vld [vmem:[#allocation3 + $0x28] sm:$0xff]   ;;  %v565_v12 = vld [vmem:[#allocation3 + $0x10] sm:$0xff]   ;;  %v566_v14 = vld [vmem:[#allocation3 + $0x18] sm:$0xff]  }
  0x2c   :  { %v569_v13 = vld [vmem:[#allocation3 + $0x30] sm:$0xff]   ;;  %v570_v15 = vld [vmem:[#allocation3 + $0x38] sm:$0xff]   ;;  %p622_p5 = por %p621_p4, %p620_p3 }
  0x2d   :  { %502 = vmatpush3.bf16.msra.mxu0 %v556_v1  ;;  %540 = vmatpush3.bf16.msra.mxu1 %v556_v1 }
  0x2e   :  { %503 = vmatprep.subr.bf16.mxu0 %v557_v2  ;;  %533 = vmatprep.subr.bf16.mxu1 %v557_v2  ;;  %p623_p6 = pnand %p622_p5, %p616_p2 }
  0x31   :  { %504 = vmatpush3.bf16.msra.mxu0 %v557_v2  ;;  %541 = vmatpush3.bf16.msra.mxu1 %v557_v2 }
  0x32   :  { %505 = vmatprep.subr.bf16.mxu0 %v558_v3  ;;  %534 = vmatprep.subr.bf16.mxu1 %v558_v3 }
  0x35   :  { %506 = vmatpush3.bf16.msra.mxu0 %v558_v3  ;;  %542 = vmatpush3.bf16.msra.mxu1 %v558_v3 }
  0x36   :  { %507 = vmatprep.subr.bf16.mxu0 %v559_v5  ;;  %535 = vmatprep.subr.bf16.mxu1 %v559_v5 }
  0x39   :  { %508 = vmatpush3.bf16.msra.mxu0 %v559_v5  ;;  %543 = vmatpush3.bf16.msra.mxu1 %v559_v5 }
  0x3a   :  { %509 = vmatprep.subr.bf16.mxu0 %v560_v7  ;;  %536 = vmatprep.subr.bf16.mxu1 %v560_v7 }
  0x3d   :  { %510 = vmatpush3.bf16.msra.mxu0 %v560_v7  ;;  %544 = vmatpush3.bf16.msra.mxu1 %v560_v7 }
  0x3e   :  { %511 = vmatprep.subr.bf16.mxu0 %v561_v8  ;;  %537 = vmatprep.subr.bf16.mxu1 %v561_v8 }
  0x41   :  { %512 = vmatpush3.bf16.msra.mxu0 %v561_v8  ;;  %545 = vmatpush3.bf16.msra.mxu1 %v561_v8 }
  0x42   :  { %513 = vmatprep.subr.bf16.mxu0 %v562_v9  ;;  %538 = vmatprep.subr.bf16.mxu1 %v562_v9 }
  0x45   :  { %514 = vmatpush3.bf16.msra.mxu0 %v562_v9  ;;  %546 = vmatpush3.bf16.msra.mxu1 %v562_v9 }
  0x48   :  { %516 = vmatmul.mubr.bf16.vlgmr.msra.gmra.mrb[0].mxu0 %v564_v10  ;;  %524 = vmatmul.mubr.bf16.vlgmr.msra.gmra.mrb[0].mxu1 %v568_v11 }
  0x49   :  { %519 = vmatprep.mubr.bf16.mxu0 %v565_v12  ;;  %527 = vmatprep.mubr.bf16.mxu1 %v569_v13 }
  0x50   :  { %520 = vmatmul.mubr.bf16.gmra.mrb[4].mxu0 %v566_v14  ;;  %528 = vmatmul.mubr.bf16.gmra.mrb[4].mxu1 %v570_v15 }
 0x11b   :  { %v517_v16 = vpop.f32.mrb[0].mxu0  ;;  %v719_v17 = vpop.f32.mrb[0].mxu1 }
 0x11c   :  { %358 = vst [vmem:[#allocation8 + $0x10] sm:$0xff] %v517_v16  ;;  %v242_v18 = vpop.f32.mrb[1].mxu0  ;;  %366 = vst [vmem:[#allocation8 + $0x50] sm:$0xff] %v719_v17  ;;  %v722_v19 = vpop.f32.mrb[1].mxu1  ;;  %v395_v27 = vmul.f32 %v517_v16, %v517_v16 }
 0x11d   :  { %356 = vst [vmem:[#allocation8] sm:$0xff] %v242_v18  ;;  %v518_v20 = vpop.f32.mrb[2].mxu0  ;;  %364 = vst [vmem:[#allocation8 + $0x40] sm:$0xff] %v722_v19  ;;  %v725_v21 = vpop.f32.mrb[2].mxu1  ;;  %v393_v24 = vmul.f32 %v242_v18, %v242_v18 }
 0x11e   :  { %359 = vst [vmem:[#allocation8 + $0x18] sm:$0xff] %v518_v20  ;;  %v245_v22 = vpop.f32.mrb[3].mxu0  ;;  %367 = vst [vmem:[#allocation8 + $0x58] sm:$0xff] %v725_v21  ;;  %v277_v23 = vpop.f32.mrb[3].mxu1  ;;  %v396_v30 = vmul.f32 %v518_v20, %v518_v20 }
 0x11f   :  { %357 = vst [vmem:[#allocation8 + $0x8] sm:$0xff] %v245_v22  ;;  %v372_v25 = vadd.f32 %v245_v22, %v242_v18  ;;  %v394_v26 = vmul.f32 %v245_v22, %v245_v22  ;;  %365 = vst [vmem:[#allocation8 + $0x48] sm:$0xff] %v277_v23 }
 0x121   :  { %v373_v28 = vadd.f32 %v517_v16, %v372_v25  ;;  %v409_v29 = vadd.f32 %v394_v26, %v393_v24 }
 0x123   :  { %v410_v31 = vadd.f32 %v409_v29, %v395_v27  ;;  %v521_v32 = vpop.f32.mrb[4].mxu0  ;;  %v374_v33 = vadd.f32 %v518_v20, %v373_v28  ;;  %v529_v34 = vpop.f32.mrb[4].mxu1 }
 0x124   :  { %362 = vst [vmem:[#allocation8 + $0x30] sm:$0xff] %v521_v32  ;;  %v258_v35 = vpop.f32.mrb[5].mxu0  ;;  %370 = vst [vmem:[#allocation8 + $0x70] sm:$0xff] %v529_v34  ;;  %v290_v36 = vpop.f32.mrb[5].mxu1 }
 0x125   :  { %360 = vst [vmem:[#allocation8 + $0x20] sm:$0xff] %v258_v35  ;;  %v375_v37 = vadd.f32 %v374_v33, %v258_v35  ;;  %v397_v38 = vmul.f32 %v258_v35, %v258_v35  ;;  %v411_v39 = vadd.f32 %v410_v31, %v396_v30  ;;  %v522_v40 = vpop.f32.mrb[6].mxu0  ;;  %368 = vst [vmem:[#allocation8 + $0x60] sm:$0xff] %v290_v36  ;;  %v530_v41 = vpop.f32.mrb[6].mxu1 }
 0x126   :  { %363 = vst [vmem:[#allocation8 + $0x38] sm:$0xff] %v522_v40  ;;  %v261_v42 = vpop.f32.mrb[7].mxu0  ;;  %371 = vst [vmem:[#allocation8 + $0x78] sm:$0xff] %v530_v41  ;;  %v293_v43 = vpop.f32.mrb[7].mxu1 }
 0x127   :  { %v412_v44 = vadd.f32 %v411_v39, %v397_v38  ;;  %361 = vst [vmem:[#allocation8 + $0x28] sm:$0xff] %v261_v42  ;;  %v376_v45 = vadd.f32 %v375_v37, %v261_v42  ;;  %v398_v46 = vmul.f32 %v261_v42, %v261_v42  ;;  %369 = vst [vmem:[#allocation8 + $0x68] sm:$0xff] %v293_v43 }
 0x128   :  { %626 = shalt.err (!%p623_p6)
}
 0x129   :  { %s627_s14 = scalar_lea.hbm %s763_s2, 2048 }
 0x12a   :  { %p628_p7 = scmp.ne.s32.totalorder %s763_s2, %s627_s14  ;;  %p631_p8 = scmp.lt.u32.totalorder %s627_s14, %s763_s2 }
 0x12c   :  { %p633_p9 = pnand %p631_p8, %p628_p7 }
 0x12e   :  { %636 = shalt.err (!%p633_p9)
}
 0x12f   :  { %s672_s19 = smov 128   ;;  %s673_s20 = smov 8   ;;  %v399_v47 = vmul.f32 %v521_v32, %v521_v32  ;;  %v377_v48 = vadd.f32 %v521_v32, %v376_v45  ;;  %v413_v49 = vadd.f32 %v412_v44, %v398_v46  ;;  %v400_v50 = vmul.f32 %v522_v40, %v522_v40 }
 0x130   :  { %446 = dma.vmem_to_hbm [thread:$0]  %s441_s10, 2048, %s763_s2, [#allocation5], %s672_s19, %s672_s19, %s673_s20   ;;  %v401_v53 = vmul.f32 %v722_v19, %v722_v19  ;;  %v402_v58 = vmul.f32 %v277_v23, %v277_v23  ;;  %v403_v59 = vmul.f32 %v719_v17, %v719_v17  ;;  %v404_v62 = vmul.f32 %v725_v21, %v725_v21 }
 0x131   :  { %v414_v51 = vadd.f32 %v413_v49, %v399_v47  ;;  %v378_v52 = vadd.f32 %v522_v40, %v377_v48  ;;  %v405_v1 = vmul.f32 %v290_v36, %v290_v36  ;;  %v406_v6 = vmul.f32 %v293_v43, %v293_v43  ;;  %s674_s2 = smov [#allocation9]  }
 0x132   :  { %v407_v7 = vmul.f32 %v529_v34, %v529_v34  ;;  %v408_v10 = vmul.f32 %v530_v41, %v530_v41  ;;  %vm430_vm0 = vcmask 1040384   ;;  %s453_s23 = sshll.u32 %s674_s2, 4  ;;  %vm432_vm1 = vcmask 1041408   ;;  %s454_s23 = int_to_ptr.vmem [resolvable:$true] %s453_s23 }
 0x133   :  { %v379_v54 = vadd.f32 %v378_v52, %v722_v19  ;;  %v415_v55 = vadd.f32 %v414_v51, %v400_v50  ;;  %s637_s24 = scalar_lea.vmem %s454_s23, 128  ;;  %p642_p11 = scmp.lt.s32.totalorder %s454_s23, %s454_s23 }
 0x134   :  { %p638_p10 = scmp.ne.s32.totalorder %s454_s23, %s637_s24  ;;  %p643_p12 = scmp.lt.s32.totalorder %s637_s24, %s637_s24 }
 0x135   :  { %v416_v56 = vadd.f32 %v415_v55, %v401_v53  ;;  %v380_v57 = vadd.f32 %v379_v54, %v277_v23 }
 0x136   :  { %p644_p13 = por %p643_p12, %p642_p11 }
 0x137   :  { %v381_v60 = vadd.f32 %v719_v17, %v380_v57  ;;  %v417_v61 = vadd.f32 %v416_v56, %v402_v58 }
 0x138   :  { %p645_p0 = pnand %p644_p13, %p638_p10 }
 0x139   :  { %v418_v63 = vadd.f32 %v417_v61, %v403_v59  ;;  %v382_v0 = vadd.f32 %v725_v21, %v381_v60 }
 0x13b   :  { %v383_v2 = vadd.f32 %v382_v0, %v290_v36  ;;  %v419_v3 = vadd.f32 %v418_v63, %v404_v62 }
 0x13d   :  { %v420_v4 = vadd.f32 %v419_v3, %v405_v1  ;;  %v384_v5 = vadd.f32 %v383_v2, %v293_v43 }
 0x13f   :  { %v385_v8 = vadd.f32 %v529_v34, %v384_v5  ;;  %v421_v9 = vadd.f32 %v420_v4, %v406_v6 }
 0x141   :  { %v386_v11 = vadd.f32 %v530_v41, %v385_v8  ;;  %v422_v12 = vadd.f32 %v421_v9, %v407_v7 }
 0x143   :  { %v387_v13 = vrot.slane %v386_v11, 4  ;;  %v423_v14 = vadd.f32 %v422_v12, %v408_v10 }
 0x145   :  { %v388_v15 = vadd.f32 %v387_v13, %v386_v11  ;;  %v424_v16 = vrot.slane %v423_v14, 4 }
 0x147   :  { %v389_v17 = vrot.slane %v388_v15, 2  ;;  %v425_v18 = vadd.f32 %v424_v16, %v423_v14 }
 0x149   :  { %v390_v19 = vadd.f32 %v389_v17, %v388_v15  ;;  %v426_v20 = vrot.slane %v425_v18, 2 }
 0x14b   :  { %v391_v21 = vrot.slane %v390_v19, 1  ;;  %v427_v22 = vadd.f32 %v426_v20, %v425_v18 }
 0x14d   :  { %v428_v23 = vrot.slane %v427_v22, 1  ;;  %v392_v24 = vadd.f32 %v391_v21, %v390_v19 }
 0x14f   :  { %v429_v25 = vadd.f32 %v428_v23, %v427_v22 }
 0x151   :  { %v431_v26 = vsel %vm430_vm0, %v392_v24, %v429_v25 }
 0x152   :  { %v433_v27 = vsel %vm432_vm1, %v431_v26, 0.0 }
 0x153   :  { %434 = vst [vmem:[#allocation9] sm:$0xff] %v433_v27 }
 0x154   :  { %648 = shalt.err (!%p645_p0)
}
 0x155   :  { %s649_s27 = scalar_lea.hbm %s764_s3, 128 }
 0x156   :  { %p650_p1 = scmp.ne.s32.totalorder %s764_s3, %s649_s27  ;;  %p653_p2 = scmp.lt.u32.totalorder %s649_s27, %s764_s3 }
 0x158   :  { %p655_p3 = pnand %p653_p2, %p650_p1 }
 0x15a   :  { %658 = shalt.err (!%p655_p3)
}
 0x15b   :  { %456 = dma.vmem_to_hbm [thread:$0]  %s454_s23, 128, %s764_s3, [#allocation10]  }
 0x15c   :  { %663 = dma.done.wait [#allocation5], 2048  }
 0x15d   :  { %664 = vsyncadd [#allocation5], 4294965248 }
 0x15e   :  { %665 = dma.done.wait [#allocation10], 128  }
 0x15f   :  { %666 = vsyncadd [#allocation10], 4294967168 }
 0x160   :  { %463 = vsyncpa [#allocation4], 1 }
 0x161   :  { %464 = vsyncpa [#allocation7], 1 }
 0x162   :  { %465 = vsyncpa [#allocation5], 1 }
 0x163   :  { %466 = vsyncpa [#allocation10], 1 }

</bundles_post_ra>
